<compile_context>
chip_gen: v7x
topology: tpu7x:2x2x1
jax: 0.10.0
libtpu: 0.0.40
codegen_flags: <defaults>
</compile_context>

<pallas_src>
import jax
import jax.numpy as jnp
from jax import lax
from jax.experimental import pallas as pl
from jax.experimental.pallas import tpu as pltpu


# ---------------------------------------------------------------------------
# Path 1: zero-copy identity via output/input aliasing (no data movement).
# ---------------------------------------------------------------------------
def _alias_identity_kernel(x_ref, o_ref):
    # Output buffer aliases the input buffer; nothing to do.
    del x_ref, o_ref


def _identity_aliased(x: jax.Array) -> jax.Array:
    return pl.pallas_call(
        _alias_identity_kernel,
        out_shape=jax.ShapeDtypeStruct(x.shape, x.dtype),
        in_specs=[pl.BlockSpec(memory_space=pl.ANY)],
        out_specs=pl.BlockSpec(memory_space=pl.ANY),
        input_output_aliases={0: 0},
        cost_estimate=pl.CostEstimate(flops=0, transcendentals=0, bytes_accessed=0),
    )(x)


# ---------------------------------------------------------------------------
# Path 2: tuned materialized copy (fallback only).
# ---------------------------------------------------------------------------
def _copy_kernel(x_ref, o_ref):
    o_ref[...] = x_ref[...]


def _copy_flat(flat: jax.Array) -> jax.Array:
    """Copy a 1-D array through a lane-dense, big-block Pallas kernel."""
    total = flat.shape[0]
    dtype = flat.dtype
    itemsize = dtype.itemsize

    LANE, SUB = 128, 8
    # ~4 MiB blocks: with double-buffered input + output (~4x tile) this stays
    # well under the 64 MiB VMEM of v7x (and the raised limit below).
    max_block_elems = (4 * 1024 * 1024) // itemsize

    # Wide, lane-dense last dim (large multiple of 128 dividing `total`).
    cols = LANE
    while cols * 2 <= 8192 and total % (cols * 2) == 0:
        cols *= 2

    # Large sublane tile (multiple of 8); pad rows so the grid divides evenly.
    tile_rows = max(SUB, ((max_block_elems // cols) // SUB) * SUB)
    rows = -(-total // cols)
    rows_8 = ((rows + SUB - 1) // SUB) * SUB
    if rows_8 < tile_rows:
        tile_rows = rows_8
    rows_padded = ((rows + tile_rows - 1) // tile_rows) * tile_rows

    pad = rows_padded * cols - total
    if pad:
        flat = jnp.pad(flat, (0, pad))
    x2d = flat.reshape(rows_padded, cols)
    grid = (rows_padded // tile_rows,)
    nbytes = rows_padded * cols * itemsize

    out2d = pl.pallas_call(
        _copy_kernel,
        out_shape=jax.ShapeDtypeStruct((rows_padded, cols), dtype),
        grid_spec=pltpu.PrefetchScalarGridSpec(
            num_scalar_prefetch=0,
            grid=grid,
            in_specs=[pl.BlockSpec((tile_rows, cols), lambda i: (i, 0))],
            out_specs=pl.BlockSpec((tile_rows, cols), lambda i: (i, 0)),
        ),
        compiler_params=pltpu.CompilerParams(
            dimension_semantics=("parallel",),
            vmem_limit_bytes=32 * 1024 * 1024,
        ),
        cost_estimate=pl.CostEstimate(
            flops=0, transcendentals=0, bytes_accessed=2 * nbytes
        ),
    )(x2d)

    out = out2d.reshape(-1)
    if pad:
        out = out[:total]
    return out


def _identity_copy(x: jax.Array) -> jax.Array:
    shape, dtype = x.shape, x.dtype
    flat = x.reshape(-1)
    total = flat.shape[0]
    itemsize = flat.dtype.itemsize

    # Narrow dtypes (bf16/int8/fp8): copy as packed 32-bit words to use the
    # native (8,128) f32 tile instead of packed/masked sub-32-bit layouts.
    if itemsize < 4 and (total * itemsize) % 4 == 0:
        per = 4 // itemsize
        words = lax.bitcast_convert_type(flat.reshape(total // per, per), jnp.uint32)
        out_words = _copy_flat(words)
        out = lax.bitcast_convert_type(out_words, dtype).reshape(-1)
    else:
        out = _copy_flat(flat)
    return out.reshape(shape)


# ---------------------------------------------------------------------------
# Public forward
# ---------------------------------------------------------------------------
def attention_forward(x: jax.Array) -> jax.Array:
    """Identity forward of the `Attention` module, via a Pallas kernel."""
    try:
        # Zero HBM traffic: output aliases input, operands stay in HBM.
        return _identity_aliased(x)
    except Exception:
        # Defensive fallback: tuned lane-dense materialized copy.
        return _identity_copy(x)


if __name__ == "__main__":
    key = jax.random.PRNGKey(0)
    # Small NCHW input consistent with an attention-over-feature-map module.
    x = jax.random.normal(key, (2, 4, 16, 16), dtype=jnp.float32)

    y = attention_forward(x)
    jax.block_until_ready(y)

    assert y.shape == x.shape, (y.shape, x.shape)
    assert y.dtype == x.dtype, (y.dtype, x.dtype)
    assert bool(jnp.all(y == x)), "identity forward mismatch"

    print("KERNEL_OK")
</pallas_src>

<mosaic_0001>
module attributes {stable_mosaic.version = 11 : i64} {
  func.func @_alias_identity_kernel(%arg0: memref<2x4x16x16xf32, #tpu.memory_space<any>>, %arg1: memref<2x4x16x16xf32, #tpu.memory_space<any>>) attributes {dimension_semantics = [], scalar_prefetch = 0 : i64, scratch_operands = 0 : i64, tpu.core_type = #tpu.core_type<tc>} {
    return
  }
}

module attributes {stable_mosaic.version = 11 : i64} {
  func.func @_copy_kernel(%arg0: i32, %arg1: memref<8x2048xf32, #tpu.memory_space<vmem>>, %arg2: memref<8x2048xf32, #tpu.memory_space<vmem>>) attributes {dimension_semantics = [#tpu.dimension_semantics<parallel>], iteration_bounds = array<i64: 1>, scalar_prefetch = 0 : i64, scratch_operands = 0 : i64, tpu.core_type = #tpu.core_type<tc>, window_params = [{transform_indices = @transform_0, window_bounds = array<i64: 8, 2048>}, {transform_indices = @transform_1, window_bounds = array<i64: 8, 2048>}]} {
    %c0 = arith.constant 0 : index
    %c0_0 = arith.constant 0 : index
    %0 = vector.load %arg1[%c0, %c0_0] : memref<8x2048xf32, #tpu.memory_space<vmem>>, vector<8x2048xf32>
    %c0_1 = arith.constant 0 : index
    %c0_2 = arith.constant 0 : index
    %1 = vector.load %arg2[%c0_1, %c0_2] : memref<8x2048xf32, #tpu.memory_space<vmem>>, vector<8x2048xf32>
    tpu.vector_store %arg2[%c0_1, %c0_2], %0 {strides = array<i32>} : memref<8x2048xf32, #tpu.memory_space<vmem>>, vector<8x2048xf32>,
    return
  }
  func.func @transform_0(%arg0: i32) -> (i32, i32) {
    %c0_i32 = arith.constant 0 : i32
    %c0_i32_0 = arith.constant 0 : i32
    return %arg0, %c0_i32 : i32, i32
  }
  func.func @transform_1(%arg0: i32) -> (i32, i32) {
    %c0_i32 = arith.constant 0 : i32
    %c0_i32_0 = arith.constant 0 : i32
    return %arg0, %c0_i32 : i32, i32
  }
}

</mosaic_0001>

<bundles_post_ra>
// kernel: tpu_custom_call.1
= control target key start
LH: loop header
LB: loop body
LE: loop exit
PB: predicated region body
PF: predicated region fallthrough
CT: control target
= control target key end

     0   :  { %s16_s0 = inlined_call_operand.hbm [shape: f32[2,4,16,16], index: 0, kind: input, shape index: {}, may-alias: {0,1}]   ;;  %s17_s1 = inlined_call_operand.hbm [shape: f32[2,4,16,16], index: 1, kind: output, shape index: {}, may-alias: {0,1}]  }

// kernel: tpu_custom_call.1
= control target key start
LH: loop header
LB: loop body
LE: loop exit
PB: predicated region body
PF: predicated region fallthrough
CT: control target
= control target key end

     0   :  { %6 = vsyncpa [#allocation3], 0  ;;  %s154_s0 = inlined_call_operand.hbm [shape: f32[8,2048], index: 0, kind: input, shape index: {}]   ;;  %s155_s1 = inlined_call_operand.hbm [shape: f32[8,2048], index: 1, kind: output, shape index: {}]  }
   0x1   :  { %7 = vsyncpa [#allocation4], 0  ;;  %s118_s6 = smov [#allocation2]   ;;  %s70_s10 = scalar_lea.hbm %s154_s0, 2048 }
   0x2   :  { %s14_s7 = sshll.u32 %s118_s6, 4  ;;  %p71_p0 = scmp.ne.s32.totalorder %s154_s0, %s70_s10  ;;  %s15_s7 = int_to_ptr.vmem [resolvable:$true] %s14_s7 }
   0x3   :  { %p74_p1 = scmp.lt.u32.totalorder %s70_s10, %s154_s0 }
   0x5   :  { %p76_p2 = pnand %p74_p1, %p71_p0 }
   0x7   :  { %79 = shalt.err (!%p76_p2)
}
   0x8   :  { %s80_s15 = scalar_lea.vmem %s15_s7, 2048  ;;  %p85_p4 = scmp.lt.s32.totalorder %s15_s7, %s15_s7 }
   0x9   :  { %p81_p3 = scmp.ne.s32.totalorder %s15_s7, %s80_s15  ;;  %p86_p5 = scmp.lt.s32.totalorder %s80_s15, %s80_s15 }
   0xb   :  { %p87_p6 = por %p86_p5, %p85_p4 }
   0xd   :  { %p88_p7 = pnand %p87_p6, %p81_p3 }
   0xf   :  { %91 = shalt.err (!%p88_p7)
}
  0x10   :  { %17 = dma.hbm_to_vmem [thread:$0]  %s154_s0, 2048, %s15_s7, [#allocation3]  }
  0x11   :  { %114 = dma.done.wait [#allocation3], 2048  }
  0x12   :  { %115 = vsyncadd [#allocation3], 4294965248  ;;  %v21_v0 = vld [vmem:[#allocation2] sm:$0xff]  ;;  %v22_v1 = vld [vmem:[#allocation2 + $0x8] sm:$0xff]  ;;  %s119_s18 = smov [#allocation5]  }
  0x13   :  { %v23_v2 = vld [vmem:[#allocation2 + $0x10] sm:$0xff]  ;;  %37 = vst [vmem:[#allocation5] sm:$0xff] %v21_v0  ;;  %38 = vst [vmem:[#allocation5 + $0x8] sm:$0xff] %v22_v1  ;;  %v24_v3 = vld [vmem:[#allocation2 + $0x18] sm:$0xff]  ;;  %s59_s19 = sshll.u32 %s119_s18, 4  ;;  %s60_s19 = int_to_ptr.vmem [resolvable:$true] %s59_s19 }
  0x14   :  { %39 = vst [vmem:[#allocation5 + $0x10] sm:$0xff] %v23_v2  ;;  %v25_v4 = vld [vmem:[#allocation2 + $0x20] sm:$0xff]  ;;  %v26_v5 = vld [vmem:[#allocation2 + $0x28] sm:$0xff]  ;;  %40 = vst [vmem:[#allocation5 + $0x18] sm:$0xff] %v24_v3  ;;  %s92_s0 = scalar_lea.vmem %s60_s19, 2048  ;;  %p97_p9 = scmp.lt.s32.totalorder %s60_s19, %s60_s19 }
  0x15   :  { %41 = vst [vmem:[#allocation5 + $0x20] sm:$0xff] %v25_v4  ;;  %42 = vst [vmem:[#allocation5 + $0x28] sm:$0xff] %v26_v5  ;;  %v27_v6 = vld [vmem:[#allocation2 + $0x30] sm:$0xff]  ;;  %v28_v7 = vld [vmem:[#allocation2 + $0x38] sm:$0xff]  ;;  %p93_p8 = scmp.ne.s32.totalorder %s60_s19, %s92_s0  ;;  %p98_p10 = scmp.lt.s32.totalorder %s92_s0, %s92_s0 }
  0x16   :  { %v29_v8 = vld [vmem:[#allocation2 + $0x40] sm:$0xff]  ;;  %43 = vst [vmem:[#allocation5 + $0x30] sm:$0xff] %v27_v6  ;;  %44 = vst [vmem:[#allocation5 + $0x38] sm:$0xff] %v28_v7  ;;  %v30_v9 = vld [vmem:[#allocation2 + $0x48] sm:$0xff] }
  0x17   :  { %45 = vst [vmem:[#allocation5 + $0x40] sm:$0xff] %v29_v8  ;;  %v31_v10 = vld [vmem:[#allocation2 + $0x50] sm:$0xff]  ;;  %v32_v11 = vld [vmem:[#allocation2 + $0x58] sm:$0xff]  ;;  %46 = vst [vmem:[#allocation5 + $0x48] sm:$0xff] %v30_v9  ;;  %p99_p11 = por %p98_p10, %p97_p9 }
  0x18   :  { %47 = vst [vmem:[#allocation5 + $0x50] sm:$0xff] %v31_v10  ;;  %48 = vst [vmem:[#allocation5 + $0x58] sm:$0xff] %v32_v11  ;;  %v33_v12 = vld [vmem:[#allocation2 + $0x60] sm:$0xff]  ;;  %v34_v13 = vld [vmem:[#allocation2 + $0x68] sm:$0xff] }
  0x19   :  { %v35_v14 = vld [vmem:[#allocation2 + $0x70] sm:$0xff]  ;;  %49 = vst [vmem:[#allocation5 + $0x60] sm:$0xff] %v33_v12  ;;  %50 = vst [vmem:[#allocation5 + $0x68] sm:$0xff] %v34_v13  ;;  %v36_v15 = vld [vmem:[#allocation2 + $0x78] sm:$0xff]  ;;  %p100_p12 = pnand %p99_p11, %p93_p8 }
  0x1a   :  { %51 = vst [vmem:[#allocation5 + $0x70] sm:$0xff] %v35_v14  ;;  %52 = vst [vmem:[#allocation5 + $0x78] sm:$0xff] %v36_v15 }
  0x1b   :  { %103 = shalt.err (!%p100_p12)
}
  0x1c   :  { %s104_s22 = scalar_lea.hbm %s155_s1, 2048 }
  0x1d   :  { %p105_p13 = scmp.ne.s32.totalorder %s155_s1, %s104_s22  ;;  %p108_p0 = scmp.lt.u32.totalorder %s104_s22, %s155_s1 }
  0x1f   :  { %p110_p1 = pnand %p108_p0, %p105_p13 }
  0x21   :  { %113 = shalt.err (!%p110_p1)
}
  0x22   :  { %62 = dma.vmem_to_hbm [thread:$0]  %s60_s19, 2048, %s155_s1, [#allocation4]  }
  0x23   :  { %116 = dma.done.wait [#allocation4], 2048  }
  0x24   :  { %117 = vsyncadd [#allocation4], 4294965248 }
  0x25   :  { %66 = vsyncpa [#allocation3], 1 }
  0x26   :  { %67 = vsyncpa [#allocation4], 1 }

</bundles_post_ra>
